<compile_context>
chip_gen: v7x
topology: tpu7x:2x2x1
jax: 0.10.0
libtpu: 0.0.40
codegen_flags: <defaults>
</compile_context>

<pallas_src>
import jax
import jax.numpy as jnp
from jax.experimental import pallas as pl
from jax.experimental.pallas import tpu as pltpu

D_EMB = 100
HEAD_SIZE = 20
DROPOUT = 0.3  # eval-mode identity

_LANE = 128


def _round_up(n, m):
    return ((n + m - 1) // m) * m


def pack_qkv_weights(w_q, w_k, w_v, dtype=jnp.bfloat16):
    """One-time packing of the three nn.Linear weights into a fused slab.

    Columns [0:Hp) = q (scaled by head_size**-0.5), [Hp:2Hp) = k, [2Hp:3Hp) = v.
    nn.Linear computes x @ W^T, so each segment holds W^T (shape (D, H)),
    zero-padded to Hp=128 lanes.  Call this once at module init, not per
    forward: it is 4+ XLA ops that would otherwise dominate this tiny kernel.
    """
    H, D = w_q.shape
    Hp = _round_up(H, _LANE)
    scale = H ** -0.5
    w = jnp.zeros((D, 3 * Hp), dtype=jnp.float32)
    w = w.at[:, 0:H].set(w_q.T.astype(jnp.float32) * scale)   # scale folded into q
    w = w.at[:, Hp:Hp + H].set(w_k.T.astype(jnp.float32))
    w = w.at[:, 2 * Hp:2 * Hp + H].set(w_v.T.astype(jnp.float32))
    return w.astype(dtype)


def _head_kernel(x_ref, wqkv_ref, o_ref):
    # x_ref:    (B, T, D)    unpadded activations (D = 100)
    # wqkv_ref: (D, 3*Hp)    fused [q*scale | k | v] projection, bf16
    # o_ref:    (B, T, Hp)   padded output (cols >= head_size are zero)
    B, T, D = x_ref.shape
    Hp = o_ref.shape[-1]

    # All B*T rows at once through one MXU matmul (bf16 operands, f32 acc).
    xf = x_ref[...].reshape(B * T, D).astype(jnp.bfloat16)
    qkv = jnp.dot(xf, wqkv_ref[...], preferred_element_type=jnp.float32)
    qkv = qkv.reshape(B, T, 3 * Hp)
    q = qkv[:, :, 0:Hp]            # already scaled by head_size**-0.5
    k = qkv[:, :, Hp:2 * Hp]
    v = qkv[:, :, 2 * Hp:3 * Hp]

    # Batched q @ k^T (contract the head dim; zero-padded lanes contribute 0).
    wei = jnp.einsum("bqh,bkh->bqk", q, k,
                     preferred_element_type=jnp.float32)       # (B, T, T)

    # Numerically stable softmax over keys, all in f32 (v5e-safe).
    wei = wei - jnp.max(wei, axis=-1, keepdims=True)
    wei = jnp.exp(wei)
    wei = wei * pl.reciprocal(jnp.sum(wei, axis=-1, keepdims=True), approx=True)

    # dropout: identity in eval mode (see TODO at top)

    out = jnp.einsum("bqk,bkh->bqh", wei, v,
                     preferred_element_type=jnp.float32)       # (B, T, Hp)
    o_ref[...] = out.astype(o_ref.dtype)                       # unmasked 128-lane store


def head_forward(x, w_qkv):
    """x: (B, T, d_emb) f32; w_qkv: pre-packed (d_emb, 3*Hp) from pack_qkv_weights."""
    B, T, D = x.shape
    Hp = w_qkv.shape[-1] // 3

    out_p = pl.pallas_call(
        _head_kernel,
        out_shape=jax.ShapeDtypeStruct((B, T, Hp), jnp.float32),
        grid_spec=pltpu.PrefetchScalarGridSpec(
            num_scalar_prefetch=0,
            grid=(1,),                                          # single step: overhead paid once
            in_specs=[
                pl.BlockSpec((B, T, D), lambda i: (0, 0, 0)),   # x, no lane padding
                pl.BlockSpec((D, 3 * Hp), lambda i: (0, 0)),    # fused bf16 W_qkv
            ],
            out_specs=pl.BlockSpec((B, T, Hp), lambda i: (0, 0, 0)),
        ),
        compiler_params=pltpu.CompilerParams(
            dimension_semantics=("arbitrary",),
        ),
    )(x, w_qkv)

    # Strip head-dim padding (20 real columns out of 128).
    return out_p[:, :, :HEAD_SIZE].astype(x.dtype)


def head_reference(x, w_q, w_k, w_v):
    """Pure-JAX f32 reference matching the PyTorch forward (eval mode)."""
    q = jnp.einsum("btd,hd->bth", x, w_q)
    k = jnp.einsum("btd,hd->bth", x, w_k)
    v = jnp.einsum("btd,hd->bth", x, w_v)
    wei = jnp.einsum("bth,bsh->bts", q, k) * (HEAD_SIZE ** -0.5)
    wei = jax.nn.softmax(wei, axis=-1)
    return jnp.einsum("bts,bsh->bth", wei, v)


if __name__ == "__main__":
    key = jax.random.PRNGKey(0)
    k_x, k_q, k_k, k_v = jax.random.split(key, 4)

    B, T = 2, 8  # small batch / sequence; d_emb and head_size fixed by module
    x = jax.random.normal(k_x, (B, T, D_EMB), dtype=jnp.float32)

    # Deterministic "Linear" weights, PyTorch shape (head_size, d_emb).
    bound = 1.0 / (D_EMB ** 0.5)
    w_q = jax.random.uniform(k_q, (HEAD_SIZE, D_EMB), jnp.float32, -bound, bound)
    w_k = jax.random.uniform(k_k, (HEAD_SIZE, D_EMB), jnp.float32, -bound, bound)
    w_v = jax.random.uniform(k_v, (HEAD_SIZE, D_EMB), jnp.float32, -bound, bound)

    # One-time weight packing (module-init cost, not per-forward).
    w_qkv = pack_qkv_weights(w_q, w_k, w_v)

    head_fwd = jax.jit(head_forward)
    out = head_fwd(x, w_qkv)
    out = jax.block_until_ready(out)

    ref = head_reference(x, w_q, w_k, w_v)
    assert out.shape == (B, T, HEAD_SIZE)
    # Tolerance covers bf16 projection operands + EUP approximate reciprocal.
    assert jnp.allclose(out, ref, atol=2e-2, rtol=2e-2), "mismatch vs reference"

    print("KERNEL_OK")
</pallas_src>

<mosaic_0001>
module attributes {stable_mosaic.version = 11 : i64} {
  func.func @_head_kernel(%arg0: i32, %arg1: memref<2x8x100xf32, #tpu.memory_space<vmem>>, %arg2: memref<100x384xbf16, #tpu.memory_space<vmem>>, %arg3: memref<2x8x128xf32, #tpu.memory_space<vmem>>) attributes {dimension_semantics = [#tpu.dimension_semantics<arbitrary>], iteration_bounds = array<i64: 1>, scalar_prefetch = 0 : i64, scratch_operands = 0 : i64, tpu.core_type = #tpu.core_type<tc>, window_params = [{pipeline_mode = #tpu.pipeline_mode<synchronous>, transform_indices = @transform_0, window_bounds = array<i64: 2, 8, 100>}, {pipeline_mode = #tpu.pipeline_mode<synchronous>, transform_indices = @transform_1, window_bounds = array<i64: 100, 384>}, {pipeline_mode = #tpu.pipeline_mode<synchronous>, transform_indices = @transform_2, window_bounds = array<i64: 2, 8, 128>}]} {
    %c0 = arith.constant 0 : index
    %c0_0 = arith.constant 0 : index
    %c0_1 = arith.constant 0 : index
    %0 = vector.load %arg1[%c0, %c0_0, %c0_1] : memref<2x8x100xf32, #tpu.memory_space<vmem>>, vector<2x8x100xf32>
    %1 = vector.shape_cast %0 : vector<2x8x100xf32> to vector<16x100xf32>
    %2 = arith.truncf %1 : vector<16x100xf32> to vector<16x100xbf16>
    %c0_2 = arith.constant 0 : index
    %c0_3 = arith.constant 0 : index
    %3 = vector.load %arg2[%c0_2, %c0_3] : memref<100x384xbf16, #tpu.memory_space<vmem>>, vector<100x384xbf16>
    %cst = arith.constant dense<0.000000e+00> : vector<16x384xf32>
    %4 = tpu.matmul %2, %3, %cst {dimension_numbers = #tpu.dot_dimension_numbers<[1], [0], [0], [1], [0, 0, 1, 1], [], []>} : vector<16x100xbf16>, vector<100x384xbf16>, vector<16x384xf32> -> vector<16x384xf32>
    %5 = vector.shape_cast %4 : vector<16x384xf32> to vector<2x8x384xf32>
    %6 = vector.extract_strided_slice %5 {offsets = [0, 0, 0], sizes = [2, 8, 128], strides = [1, 1, 1]} : vector<2x8x384xf32> to vector<2x8x128xf32>
    %7 = vector.extract_strided_slice %5 {offsets = [0, 0, 128], sizes = [2, 8, 128], strides = [1, 1, 1]} : vector<2x8x384xf32> to vector<2x8x128xf32>
    %8 = vector.extract_strided_slice %5 {offsets = [0, 0, 256], sizes = [2, 8, 128], strides = [1, 1, 1]} : vector<2x8x384xf32> to vector<2x8x128xf32>
    "tpu.trace_start"() <{level = 10 : i32, message = "bqh,bkh->bqk"}> : () -> ()
    %cst_4 = arith.constant dense<0.000000e+00> : vector<2x8x8xf32>
    %9 = tpu.matmul %6, %7, %cst_4 {dimension_numbers = #tpu.dot_dimension_numbers<[2], [2], [1], [1], [0, 0, 0, 1, 1, 1], [0], [0]>} : vector<2x8x128xf32>, vector<2x8x128xf32>, vector<2x8x8xf32> -> vector<2x8x8xf32>
    "tpu.trace_stop"() : () -> ()
    %cst_5 = arith.constant dense<0xFF800000> : vector<2x8xf32>
    %10 = vector.multi_reduction <maximumf>, %9, %cst_5 [2] : vector<2x8x8xf32> to vector<2x8xf32>
    %11 = vector.shape_cast %10 : vector<2x8xf32> to vector<2x8x1xf32>
    %12 = vector.broadcast %11 : vector<2x8x1xf32> to vector<2x8x8xf32>
    %13 = arith.subf %9, %12 : vector<2x8x8xf32>
    %14 = math.exp %13 : vector<2x8x8xf32>
    %cst_6 = arith.constant dense<0.000000e+00> : vector<2x8xf32>
    %15 = vector.multi_reduction <add>, %14, %cst_6 [2] : vector<2x8x8xf32> to vector<2x8xf32>
    %16 = vector.shape_cast %15 : vector<2x8xf32> to vector<2x8x1xf32>
    %17 = tpu.reciprocal %16 {approx = true} : vector<2x8x1xf32> -> vector<2x8x1xf32>
    %18 = vector.broadcast %17 : vector<2x8x1xf32> to vector<2x8x8xf32>
    %19 = arith.mulf %14, %18 : vector<2x8x8xf32>
    "tpu.trace_start"() <{level = 10 : i32, message = "bqk,bkh->bqh"}> : () -> ()
    %cst_7 = arith.constant dense<0.000000e+00> : vector<2x8x128xf32>
    %20 = tpu.matmul %19, %8, %cst_7 {dimension_numbers = #tpu.dot_dimension_numbers<[2], [1], [1], [2], [0, 0, 0, 1, 1, 2], [0], [0]>} : vector<2x8x8xf32>, vector<2x8x128xf32>, vector<2x8x128xf32> -> vector<2x8x128xf32>
    "tpu.trace_stop"() : () -> ()
    %c0_8 = arith.constant 0 : index
    %c0_9 = arith.constant 0 : index
    %c0_10 = arith.constant 0 : index
    %21 = vector.load %arg3[%c0_8, %c0_9, %c0_10] : memref<2x8x128xf32, #tpu.memory_space<vmem>>, vector<2x8x128xf32>
    tpu.vector_store %arg3[%c0_8, %c0_9, %c0_10], %20 {strides = array<i32>} : memref<2x8x128xf32, #tpu.memory_space<vmem>>, vector<2x8x128xf32>,
    return
  }
  func.func @transform_0(%arg0: i32) -> (i32, i32, i32) {
    %c0_i32 = arith.constant 0 : i32
    %c0_i32_0 = arith.constant 0 : i32
    %c0_i32_1 = arith.constant 0 : i32
    %c0_i32_2 = arith.constant 0 : i32
    return %c0_i32, %c0_i32_0, %c0_i32_1 : i32, i32, i32
  }
  func.func @transform_1(%arg0: i32) -> (i32, i32) {
    %c0_i32 = arith.constant 0 : i32
    %c0_i32_0 = arith.constant 0 : i32
    %c0_i32_1 = arith.constant 0 : i32
    return %c0_i32, %c0_i32_0 : i32, i32
  }
  func.func @transform_2(%arg0: i32) -> (i32, i32, i32) {
    %c0_i32 = arith.constant 0 : i32
    %c0_i32_0 = arith.constant 0 : i32
    %c0_i32_1 = arith.constant 0 : i32
    %c0_i32_2 = arith.constant 0 : i32
    return %c0_i32, %c0_i32_0, %c0_i32_1 : i32, i32, i32
  }
}

</mosaic_0001>

<bundles_post_ra>
// kernel: head_forward.1
= control target key start
LH: loop header
LB: loop body
LE: loop exit
PB: predicated region body
PF: predicated region fallthrough
CT: control target
= control target key end

     0   :  { %7 = vsyncpa [#allocation3], 0  ;;  %s895_s0 = inlined_call_operand.hbm [shape: f32[2,8,100], index: 0, kind: input, shape index: {}]   ;;  %s896_s1 = inlined_call_operand.hbm [shape: bf16[100,384], index: 1, kind: input, shape index: {}]   ;;  %s897_s2 = inlined_call_operand.hbm [shape: f32[2,8,128], index: 2, kind: output, shape index: {}]  }
   0x1   :  { %8 = vsyncpa [#allocation6], 0 }
   0x2   :  { %9 = vsyncpa [#allocation4], 0  ;;  %s798_s9 = smov [#allocation2]   ;;  %s726_s13 = scalar_lea.hbm %s895_s0, 256 }
   0x3   :  { %s15_s10 = sshll.u32 %s798_s9, 4  ;;  %p727_p0 = scmp.ne.s32.totalorder %s895_s0, %s726_s13  ;;  %s16_s10 = int_to_ptr.vmem [resolvable:$true] %s15_s10 }
   0x4   :  { %p730_p1 = scmp.lt.u32.totalorder %s726_s13, %s895_s0 }
   0x6   :  { %p732_p2 = pnand %p730_p1, %p727_p0 }
   0x8   :  { %735 = shalt.err (!%p732_p2)
}
   0x9   :  { %s736_s18 = scalar_lea.vmem %s16_s10, 256  ;;  %p741_p4 = scmp.lt.s32.totalorder %s16_s10, %s16_s10 }
   0xa   :  { %p737_p3 = scmp.ne.s32.totalorder %s16_s10, %s736_s18  ;;  %p742_p5 = scmp.lt.s32.totalorder %s736_s18, %s736_s18 }
   0xc   :  { %p743_p6 = por %p742_p5, %p741_p4 }
   0xe   :  { %p744_p7 = pnand %p743_p6, %p737_p3 }
  0x10   :  { %747 = shalt.err (!%p744_p7)
}
  0x11   :  { %s799_s19 = smov 128   ;;  %s800_s20 = smov 8  }
  0x12   :  { %21 = dma.hbm_to_vmem [thread:$0]  %s895_s0, 256, %s16_s10, [#allocation3], %s799_s19, %s799_s19, %s800_s20  }
  0x13   :  { %s801_s23 = smov [#allocation5]   ;;  %s748_s27 = scalar_lea.hbm %s896_s1, 2496 }
  0x14   :  { %s27_s24 = sshll.u32 %s801_s23, 4  ;;  %p749_p8 = scmp.ne.s32.totalorder %s896_s1, %s748_s27  ;;  %s28_s24 = int_to_ptr.vmem [resolvable:$true] %s27_s24 }
  0x15   :  { %p752_p9 = scmp.lt.u32.totalorder %s748_s27, %s896_s1 }
  0x17   :  { %p754_p10 = pnand %p752_p9, %p749_p8 }
  0x19   :  { %757 = shalt.err (!%p754_p10)
}
  0x1a   :  { %s758_s4 = scalar_lea.vmem %s28_s24, 2496  ;;  %p763_p12 = scmp.lt.s32.totalorder %s28_s24, %s28_s24 }
  0x1b   :  { %p759_p11 = scmp.ne.s32.totalorder %s28_s24, %s758_s4  ;;  %p764_p13 = scmp.lt.s32.totalorder %s758_s4, %s758_s4 }
  0x1d   :  { %p765_p0 = por %p764_p13, %p763_p12 }
  0x1f   :  { %p766_p1 = pnand %p765_p0, %p759_p11 }
  0x21   :  { %769 = shalt.err (!%p766_p1)
}
  0x22   :  { %s802_s0 = smov 192   ;;  %s803_s5 = smov 12  }
  0x23   :  { %33 = dma.hbm_to_vmem [thread:$0]  %s896_s1, 2496, %s28_s24, [#allocation6], %s802_s0, %s802_s0, %s803_s5  }
  0x24   :  { %792 = dma.done.wait [#allocation3], 256  }
  0x25   :  { %793 = vsyncadd [#allocation3], 4294967040 }
  0x26   :  { %794 = dma.done.wait [#allocation6], 2496  }
  0x27   :  { %795 = vsyncadd [#allocation6], 4294964800  ;;  %v804_v0 = vmov 0   ;;  %v805_v1 = vmov 0.0   ;;  %vm806_vm0 = vmmov 0   ;;  %vm178_vm1 = vcmask 1041408  }
  0x28   :  { %220 = vmatprep.mubr.bf16.mxu0 %v804_v0  ;;  %643 = vmatprep.subr.bf16.mxu1 %v805_v1  ;;  %v691_v2 = vld [vmem:[#allocation5 + $0x4] ss:$12 sps:$4 sm:$0xff]   ;;  %v693_v3 = vld [vmem:[#allocation5] ss:$12 sps:$4 sm:$0xff]   ;;  %v694_v4 = vld [vmem:[#allocation5 + $0x1c] ss:$12 sps:$4 sm:$0xff]  }
  0x29   :  { %657 = vmatprep.mubr.msk.bf16.mxu1 %vm806_vm0, %v805_v1  ;;  %188 = vmatprep.subr.bf16.mxu0 %v691_v2  ;;  %v696_v5 = vld [vmem:[#allocation5 + $0x18] ss:$12 sps:$4 sm:$0xff]   ;;  %v697_v6 = vld [vmem:[#allocation5 + $0x34] ss:$12 sps:$4 sm:$0xff]   ;;  %v699_v7 = vld [vmem:[#allocation5 + $0x30] ss:$12 sps:$4 sm:$0xff]  }
  0x2a   :  { %189 = vmatpush1.bf16.msra.mxu0 %v693_v3  ;;  %v700_v8 = vld [vmem:[#allocation5 + $0x4c] ss:$12 sps:$4 sm:$0xff]   ;;  %v711_v9 = vld [vmem:[#allocation5 + $0x8] ss:$12 sps:$4 sm:$0xff]   ;;  %v703_v12 = vld [vmem:[#allocation5 + $0x64] ss:$12 sps:$4 sm:$0xff]  }
  0x2b   :  { %190 = vmatprep.subr.bf16.mxu0 %v694_v4  ;;  %v702_v10 = vld [vmem:[#allocation5 + $0x48] ss:$12 sps:$4 sm:$0xff]   ;;  %644 = vmatpush3.bf16.msra.mxu1 %v711_v9  ;;  %v712_v11 = vld [vmem:[#allocation5 + $0x20] ss:$12 sps:$4 sm:$0xff]   ;;  %v713_v14 = vld [vmem:[#allocation5 + $0x38] ss:$12 sps:$4 sm:$0xff]  }
  0x2c   :  { %645 = vmatprep.subr.bf16.mxu1 %v805_v1  ;;  %v705_v13 = vld [vmem:[#allocation5 + $0x60] ss:$12 sps:$4 sm:$0xff]   ;;  %v706_v15 = vld [vmem:[#allocation5 + $0x7c] ss:$12 sps:$4 sm:$0xff]   ;;  %v68_v16 = vld [vmem:[#allocation5 + $0x90] sm:$0x33] }
  0x2d   :  { %v708_v17 = vld [vmem:[#allocation5 + $0x78] ss:$12 sps:$4 sm:$0xff]   ;;  %v714_v18 = vld [vmem:[#allocation5 + $0x50] ss:$12 sps:$4 sm:$0xff]   ;;  %v620_v19 = vcombine.high %v68_v16, %v68_v16  ;;  %v619_v20 = vcombine.low %v68_v16, %v68_v16  ;;  %v715_v23 = vld [vmem:[#allocation5 + $0x68] ss:$12 sps:$4 sm:$0xff]  }
  0x2e   :  { %191 = vmatpush1.bf16.msra.mxu0 %v696_v5  ;;  %v41_v21 = vld [vmem:[#allocation2] sm:$0xff]  ;;  %v42_v22 = vld [vmem:[#allocation2 + $0x8] sm:$0xff]  ;;  %vm174_vm2 = vcmask 818176   ;;  %v716_v26 = vld [vmem:[#allocation5 + $0x80] ss:$12 sps:$4 sm:$0xff]   ;;  %vm412_vm3 = vcmask 64512  }
  0x2f   :  { %192 = vmatprep.subr.bf16.mxu0 %v697_v6  ;;  %646 = vmatpush3.bf16.msra.mxu1 %v712_v11  ;;  %v180_v24 = vsel %vm178_vm1, %v619_v20, 0  ;;  %v43_v25 = vpack.c.bf16 %v42_v22, %v41_v21  ;;  %v717_v27 = vld [vmem:[#allocation5 + $0x98] ss:$0 sps:$4 sm:$0x33]   ;;  %s807_s1 = smov [#allocation7]  }
  0x30   :  { %647 = vmatprep.subr.bf16.mxu1 %v805_v1  ;;  %v186_v28 = vsel %vm178_vm1, %v717_v27, 0  ;;  %s588_s8 = sshll.u32 %s807_s1, 4  ;;  %s589_s8 = int_to_ptr.vmem [resolvable:$true] %s588_s8 }
  0x31   :  { %s770_s9 = scalar_lea.vmem %s589_s8, 256  ;;  %p775_p3 = scmp.lt.s32.totalorder %s589_s8, %s589_s8 }
  0x32   :  { %193 = vmatpush1.bf16.msra.mxu0 %v699_v7  ;;  %p771_p2 = scmp.ne.s32.totalorder %s589_s8, %s770_s9  ;;  %p776_p4 = scmp.lt.s32.totalorder %s770_s9, %s770_s9 }
  0x33   :  { %194 = vmatprep.subr.bf16.mxu0 %v700_v8  ;;  %648 = vmatpush3.bf16.msra.mxu1 %v713_v14 }
  0x34   :  { %649 = vmatprep.subr.bf16.mxu1 %v805_v1  ;;  %p777_p5 = por %p776_p4, %p775_p3 }
  0x36   :  { %195 = vmatpush1.bf16.msra.mxu0 %v702_v10  ;;  %p778_p6 = pnand %p777_p5, %p771_p2 }
  0x37   :  { %196 = vmatprep.subr.bf16.mxu0 %v703_v12  ;;  %650 = vmatpush3.bf16.msra.mxu1 %v714_v18 }
  0x38   :  { %651 = vmatprep.subr.bf16.mxu1 %v805_v1 }
  0x3a   :  { %197 = vmatpush1.bf16.msra.mxu0 %v705_v13 }
  0x3b   :  { %198 = vmatprep.subr.bf16.mxu0 %v706_v15  ;;  %652 = vmatpush3.bf16.msra.mxu1 %v715_v23 }
  0x3c   :  { %653 = vmatprep.subr.bf16.mxu1 %v805_v1 }
  0x3e   :  { %199 = vmatpush1.bf16.msra.mxu0 %v708_v17 }
  0x3f   :  { %622 = vmatprep.subr.msk.bf16.mxu0 %vm178_vm1, %v620_v19  ;;  %654 = vmatpush3.bf16.msra.mxu1 %v716_v26 }
  0x40   :  { %655 = vmatprep.subr.bf16.mxu1 %v805_v1 }
  0x42   :  { %201 = vmatpush1.bf16.msra.mxu0 %v180_v24 }
  0x43   :  { %661 = vmatprep.subr.mxu0 %v805_v1  ;;  %656 = vmatpush3.bf16.msra.mxu1 %v186_v28 }
  0x44   :  { %666 = vmatprep.subr.mxu1 %v805_v1 }
  0x45   :  { %623 = vmatmul.mubr.msk.bf16.vlgmr.msra.gmra.mrb[0].mxu0 %vm174_vm2, %v43_v25 }
  0x46   :  { %663 = vmatprep.mubr.msk.f32.mxu0 %vm806_vm0, %v805_v1  ;;  %658 = vmatmul.mubr.msk.bf16.vlgmr.msra.gmra.mrb[0].mxu1 %vm174_vm2, %v43_v25 }
  0x47   :  { %668 = vmatprep.mubr.msk.f32.mxu1 %vm806_vm0, %v805_v1 }
 0x118   :  { %v222_v29 = vpop.f32.mrb[0].mxu0 }
 0x119   :  { %v224_v30 = vpop.f32.mrb[1].mxu0  ;;  %v265_v33 = vpop.f32.mrb[0].mxu1 }
 0x11a   :  { %v226_v31 = vpop.f32.mrb[2].mxu0  ;;  %662 = vmatpush3.xpose.msra.mxu0 %v224_v30  ;;  %v659_v34 = vpop.f32.mrb[1].mxu1 }
 0x11b   :  { %v228_v32 = vpop.f32.mrb[3].mxu0  ;;  %671 = vmatprep.subr.mxu0 %v805_v1  ;;  %v268_v35 = vpop.f32.mrb[2].mxu1 }
 0x11c   :  { %667 = vmatpush3.xpose.msra.mxu1 %v228_v32  ;;  %v660_v36 = vpop.f32.mrb[3].mxu1 }
 0x11d   :  { %664 = vmatmul.mubr.f32.vlgmr.msra.gmra.mrb[4].mxu0 %v222_v29  ;;  %676 = vmatprep.subr.mxu1 %v805_v1 }
 0x11e   :  { %673 = vmatprep.mubr.msk.f32.mxu0 %vm806_vm0, %v805_v1  ;;  %672 = vmatpush3.msra.mxu0 %v265_v33 }
 0x11f   :  { %669 = vmatmul.mubr.f32.vlgmr.msra.gmra.mrb[4].mxu1 %v226_v31 }
 0x120   :  { %678 = vmatprep.mubr.msk.f32.mxu1 %vm806_vm0, %v805_v1  ;;  %677 = vmatpush3.msra.mxu1 %v268_v35 }
 0x1f0   :  { %v338_v37 = vpop.f32.mrb[4].mxu0 }
 0x1f1   :  { %v665_v38 = vpop.f32.mrb[5].mxu0  ;;  %v413_v39 = vsel %vm412_vm3, %v338_v37, -inf }
 0x1f2   :  { %v408_v40 = vpop.f32.mrb[4].mxu1  ;;  %414 = vmax.xlane.f32.xlu0 %v413_v39 }
 0x1f3   :  { %v670_v41 = vpop.f32.mrb[5].mxu1  ;;  %v416_v42 = vsel %vm412_vm3, %v408_v40, -inf }
 0x1f6   :  { %417 = vmax.xlane.f32.xlu0 %v416_v42 }
 0x27f   :  { %v415_v43 = vpop.xlane.xlu0 %414 }
 0x280   :  { %v419_v44 = vsub.f32 %v338_v37, %v415_v43 }
 0x282   :  { %v421_v45 = vmul.f32 1.442695, %v419_v44 }
 0x283   :  { %v418_v46 = vpop.xlane.xlu0 %417 }
 0x284   :  { %718 = vpow2.f32 %v421_v45  ;;  %v420_v47 = vsub.f32 %v408_v40, %v418_v46 }
 0x286   :  { %v423_v48 = vmul.f32 1.442695, %v420_v47 }
 0x288   :  { %720 = vpow2.f32 %v423_v48 }
 0x28e   :  { %v719_v49 = vpop.eup %718 }
 0x28f   :  { %v425_v50 = vsel %vm412_vm3, %v719_v49, 0.0 }
 0x290   :  { %426 = vadd.xlane.f32.xlu1 %v425_v50 }
 0x292   :  { %v721_v51 = vpop.eup %720 }
 0x293   :  { %v428_v52 = vsel %vm412_vm3, %v721_v51, 0.0 }
 0x294   :  { %429 = vadd.xlane.f32.xlu1 %v428_v52 }
 0x31d   :  { %v427_v53 = vpop.xlane.xlu1 %426 }
 0x31e   :  { %722 = vrcp.f32 %v427_v53 }
 0x321   :  { %v430_v54 = vpop.xlane.xlu1 %429 }
 0x322   :  { %724 = vrcp.f32 %v430_v54 }
 0x328   :  { %v723_v55 = vpop.eup %722 }
 0x329   :  { %v433_v56 = vmul.f32 %v723_v55, %v719_v49 }
 0x32b   :  { %674 = vmatmul.mubr.msk.f32.vlgmr.msra.gmra.mrb[6].mxu0 %vm412_vm3, %v433_v56 }
 0x32c   :  { %v725_v57 = vpop.eup %724 }
 0x32d   :  { %v434_v58 = vmul.f32 %v725_v57, %v721_v51 }
 0x32f   :  { %679 = vmatmul.mubr.msk.f32.vlgmr.msra.gmra.mrb[6].mxu1 %vm412_vm3, %v434_v58 }
 0x3fe   :  { %v504_v59 = vpop.f32.mrb[6].mxu0 }
 0x3ff   :  { %581 = vst [vmem:[#allocation7] sm:$0xff] %v504_v59  ;;  %v675_v60 = vpop.f32.mrb[7].mxu0 }
 0x402   :  { %v577_v61 = vpop.f32.mrb[6].mxu1 }
 0x403   :  { %582 = vst [vmem:[#allocation7 + $0x8] sm:$0xff] %v577_v61  ;;  %v680_v62 = vpop.f32.mrb[7].mxu1 }
 0x404   :  { %781 = shalt.err (!%p778_p6)
}
 0x405   :  { %s782_s12 = scalar_lea.hbm %s897_s2, 256 }
 0x406   :  { %p783_p7 = scmp.ne.s32.totalorder %s897_s2, %s782_s12  ;;  %p786_p8 = scmp.lt.u32.totalorder %s782_s12, %s897_s2 }
 0x408   :  { %p788_p9 = pnand %p786_p8, %p783_p7 }
 0x40a   :  { %791 = shalt.err (!%p788_p9)
}
 0x40b   :  { %594 = dma.vmem_to_hbm [thread:$0]  %s589_s8, 256, %s897_s2, [#allocation4], %s799_s19, %s799_s19, %s800_s20  }
 0x40c   :  { %796 = dma.done.wait [#allocation4], 256  }
 0x40d   :  { %797 = vsyncadd [#allocation4], 4294967040 }
 0x40e   :  { %598 = vsyncpa [#allocation3], 1 }
 0x40f   :  { %599 = vsyncpa [#allocation6], 1 }
 0x410   :  { %600 = vsyncpa [#allocation4], 1 }

</bundles_post_ra>
